<compile_context>
chip_gen: v6e
topology: v6e:2x2x1
jax: 0.10.0
libtpu: 0.0.40
codegen_flags: <defaults>
</compile_context>

<pallas_src>
import functools
import math

import jax
import jax.numpy as jnp
from jax.experimental import pallas as pl
from jax.experimental.pallas import tpu as pltpu

_BN_EPS = 1e-5


# ----------------------------------------------------------------------------
# Fused Bottleneck kernel
# ----------------------------------------------------------------------------
def _bottleneck_kernel(*refs, stride, has_ds, tl):
    it = iter(refs)
    x_ref = next(it)                       # (L, C_in)   f32, whole batch element
    w1_ref = next(it); b1_ref = next(it)   # (C_in, C)   bf16 (BN1 scale folded), (1, C)
    w2_ref = next(it); b2_ref = next(it)   # (3*C, C)    bf16 (BN2 scale folded), (1, C)
    w3_ref = next(it); b3_ref = next(it)   # (C, C_exp)  bf16 (BN3 scale folded), (1, C_exp)
    sel_ref = next(it) if stride > 1 else None      # (tlo, tl) one-hot bf16
    if has_ds:
        wd_ref = next(it); bd_ref = next(it)         # (C_in, C_exp) bf16, (1, C_exp)
    o_ref = next(it)                       # (tlo, C_exp) f32

    L = x_ref.shape[0]
    l = pl.program_id(1)
    nlt = pl.num_programs(1)
    row0 = l * tl                          # first input row of this length tile

    # ---- x window: own rows + one halo row each side (clamped; masked later) ----
    x_own = x_ref[pl.ds(row0, tl), :]                                   # (tl, C_in)
    left_i = jnp.maximum(row0 - 1, 0)
    right_i = jnp.minimum(row0 + tl, L - 1)
    x_left = x_ref[pl.ds(left_i, 1), :]                                 # (1, C_in)
    x_right = x_ref[pl.ds(right_i, 1), :]                               # (1, C_in)
    xw = jnp.concatenate([x_left, x_own, x_right], axis=0)              # (tl+2, C_in)

    # ---- Conv1 (1x1) + BN1 + tanh; halo rows masked to the zero padding ----------
    z1 = jnp.dot(xw.astype(jnp.bfloat16), w1_ref[...],
                 preferred_element_type=jnp.float32)
    y1p = jnp.tanh(z1 + b1_ref[...])                                    # (tl+2, C) f32
    ridx = jax.lax.broadcasted_iota(jnp.int32, (tl + 2, 1), 0)
    valid = jnp.logical_and(jnp.logical_or(ridx > 0, l > 0),
                            jnp.logical_or(ridx < tl + 1, l < nlt - 1))
    y1p = jnp.where(valid, y1p, 0.0)

    # ---- Conv2 (k=3, pad=1, stride) as ONE fused K=3*C matmul ---------------------
    taps = jnp.concatenate([y1p[0:tl], y1p[1:tl + 1], y1p[2:tl + 2]], axis=-1)
    taps = taps.astype(jnp.bfloat16)                                    # (tl, 3*C)
    if stride > 1:
        # Strided row selection via one-hot matmul (exact for bf16 values; keeps the
        # MXU busy instead of emitting sublane-strided / masked loads).
        taps = jnp.dot(sel_ref[...], taps,
                       preferred_element_type=jnp.float32).astype(jnp.bfloat16)
    z2 = jnp.dot(taps, w2_ref[...], preferred_element_type=jnp.float32)
    y2 = jnp.tanh(z2 + b2_ref[...])                                     # (tlo, C) f32

    # ---- Conv3 (1x1) + BN3 + residual + tanh --------------------------------------
    y3 = jnp.dot(y2.astype(jnp.bfloat16), w3_ref[...],
                 preferred_element_type=jnp.float32) + b3_ref[...]
    if has_ds:
        xs = x_own.astype(jnp.bfloat16)
        if stride > 1:
            xs = jnp.dot(sel_ref[...], xs,
                         preferred_element_type=jnp.float32).astype(jnp.bfloat16)
        ident = jnp.dot(xs, wd_ref[...],
                        preferred_element_type=jnp.float32) + bd_ref[...]
    else:
        ident = x_own                                                   # f32 identity
    o_ref[...] = jnp.tanh(y3 + ident).astype(o_ref.dtype)


# ----------------------------------------------------------------------------
# BN folding / parameter prep (shared by kernel wrapper and reference)
# ----------------------------------------------------------------------------
def _fold_scale_shift(bn):
    scale = bn["gamma"] / jnp.sqrt(bn["var"] + _BN_EPS)
    shift = bn["beta"] - bn["mean"] * scale
    return scale, shift


def _prepare_params(params):
    """Fold BN scales into conv weights (bf16 for the MXU); keep shifts in f32."""
    s1, b1 = _fold_scale_shift(params["bn1"])
    s2, b2 = _fold_scale_shift(params["bn2"])
    s3, b3 = _fold_scale_shift(params["bn3"])
    C_out = params["conv1"].shape[1]
    prep = dict(
        w1=(params["conv1"] * s1).astype(jnp.bfloat16),
        b1=b1.reshape(1, -1).astype(jnp.float32),
        w2=(params["conv2"] * s2).reshape(3 * C_out, C_out).astype(jnp.bfloat16),
        b2=b2.reshape(1, -1).astype(jnp.float32),
        w3=(params["conv3"] * s3).astype(jnp.bfloat16),
        b3=b3.reshape(1, -1).astype(jnp.float32),
    )
    if "ds_conv" in params:
        sd, bd = _fold_scale_shift(params["ds_bn"])
        prep["wd"] = (params["ds_conv"] * sd).astype(jnp.bfloat16)
        prep["bd"] = bd.reshape(1, -1).astype(jnp.float32)
    return prep


# ----------------------------------------------------------------------------
# Wrapper
# ----------------------------------------------------------------------------
def bottleneck_forward(x, params, *, stride=1, out_tile_rows=8):
    """Fused Bottleneck forward.  x: (B, L, C_in) float32, NLC layout."""
    B, L, C_in = x.shape
    C_exp = params["conv3"].shape[1]
    L_out = (L + 2 - 3) // stride + 1
    has_ds = "ds_conv" in params
    if not has_ds:
        assert stride == 1 and C_in == C_exp, "identity path needs matching shapes"

    prep = _prepare_params(params)

    # ---- length tiling: tlo output rows per grid step, tl = tlo*stride input rows.
    # For real workloads raise out_tile_rows (e.g. 128-512) to fill the MXU M dim and
    # re-derive against the VMEM budget (v7x: 64 MiB physical).
    tlo = int(out_tile_rows)
    tl = tlo * stride
    nlt = L // tl if tl > 0 else 0
    if (tlo >= L_out or tl > L or L % tl != 0 or L_out % tlo != 0
            or nlt * tlo != L_out or tlo % 8 != 0):
        tlo, tl, nlt = L_out, L, 1        # single full-length tile (always legal)

    args = [x, prep["w1"], prep["b1"], prep["w2"], prep["b2"], prep["w3"], prep["b3"]]
    if stride > 1:
        io = jax.lax.broadcasted_iota(jnp.int32, (tlo, tl), 0)
        ii = jax.lax.broadcasted_iota(jnp.int32, (tlo, tl), 1)
        sel = (ii == stride * io).astype(jnp.bfloat16)     # one-hot row selector
        args.append(sel)
    if has_ds:
        args += [prep["wd"], prep["bd"]]

    def resident(a):  # weights / shifts / selector: whole array, VMEM-resident
        return pl.BlockSpec(a.shape, lambda b, l, _nd=a.ndim: (0,) * _nd)

    # x stays resident per batch element (same block index across the length axis),
    # each step reads its own tile + 1-row halo from it.
    in_specs = [pl.BlockSpec((None, L, C_in), lambda b, l: (b, 0, 0))]
    in_specs += [resident(a) for a in args[1:]]

    kernel = functools.partial(_bottleneck_kernel, stride=stride, has_ds=has_ds, tl=tl)

    return pl.pallas_call(
        kernel,
        grid=(B, nlt),
        in_specs=in_specs,
        out_specs=pl.BlockSpec((None, tlo, C_exp), lambda b, l: (b, l, 0)),
        out_shape=jax.ShapeDtypeStruct((B, L_out, C_exp), jnp.float32),
        compiler_params=pltpu.CompilerParams(
            dimension_semantics=("parallel", "parallel"),
            vmem_limit_bytes=32 * 1024 * 1024,
        ),
    )(*args)


# ----------------------------------------------------------------------------
# Deterministic synthetic parameters (weights stored as (K, C_in, C_out))
# ----------------------------------------------------------------------------
def make_bottleneck_params(key, C_in, C_out, expansion, with_downsample):
    C_exp = int(C_out * expansion)
    keys = iter(jax.random.split(key, 32))
    nk = lambda: next(keys)

    def conv_w(k, cin, cout):
        w = jax.random.normal(nk(), (k, cin, cout), jnp.float32) / math.sqrt(k * cin)
        return w[0] if k == 1 else w

    def bn_p(c):
        return dict(
            gamma=1.0 + 0.1 * jax.random.normal(nk(), (c,), jnp.float32),
            beta=0.1 * jax.random.normal(nk(), (c,), jnp.float32),
            mean=0.1 * jax.random.normal(nk(), (c,), jnp.float32),
            var=1.0 + 0.1 * jnp.abs(jax.random.normal(nk(), (c,), jnp.float32)),
        )

    p = {
        "conv1": conv_w(1, C_in, C_out), "bn1": bn_p(C_out),
        "conv2": conv_w(3, C_out, C_out), "bn2": bn_p(C_out),
        "conv3": conv_w(1, C_out, C_exp), "bn3": bn_p(C_exp),
    }
    if with_downsample:
        p["ds_conv"] = conv_w(1, C_in, C_exp)
        p["ds_bn"] = bn_p(C_exp)
    return p


# ----------------------------------------------------------------------------
# Pure-JAX reference (same folded-BN / bf16-operand / f32-accumulate strategy)
# ----------------------------------------------------------------------------
def bottleneck_ref(x, params, *, stride=1):
    B, L, _ = x.shape
    prep = _prepare_params(params)
    L_out = (L + 2 - 3) // stride + 1

    def mm(a, w):
        return jnp.einsum("blc,cd->bld", a.astype(jnp.bfloat16), w,
                          preferred_element_type=jnp.float32)

    y1 = jnp.tanh(mm(x, prep["w1"]) + prep["b1"])
    y1p = jnp.pad(y1, ((0, 0), (1, 1), (0, 0)))
    taps = jnp.concatenate([y1p[:, k:k + L, :] for k in range(3)], axis=-1)
    taps = taps[:, ::stride, :][:, :L_out, :]
    y2 = jnp.tanh(mm(taps, prep["w2"]) + prep["b2"])
    y3 = mm(y2, prep["w3"]) + prep["b3"]
    if "ds_conv" in params:
        ident = mm(x[:, ::stride][:, :L_out], prep["wd"]) + prep["bd"]
    else:
        ident = x
    return jnp.tanh(y3 + ident)


# ----------------------------------------------------------------------------
if __name__ == "__main__":
    key = jax.random.PRNGKey(0)
    k1, k2, k3, k4 = jax.random.split(key, 4)

    B, L = 2, 16
    C_out, expansion = 32, 4
    C_exp = C_out * expansion            # 128 -> lane-dense output channels

    # Case 1: default Bottleneck (stride=1, downsample=None) -> C_in == C_out*expansion
    p1 = make_bottleneck_params(k1, C_exp, C_out, expansion, with_downsample=False)
    x1 = jax.random.normal(k2, (B, L, C_exp), jnp.float32)
    fwd1 = jax.jit(functools.partial(bottleneck_forward, stride=1))
    out1 = jax.block_until_ready(fwd1(x1, p1))
    ref1 = bottleneck_ref(x1, p1, stride=1)
    assert out1.shape == (B, L, C_exp), out1.shape
    assert bool(jnp.all(jnp.isfinite(out1)))
    err1 = float(jnp.max(jnp.abs(out1 - ref1)))
    assert err1 < 5e-3, f"case1 max err {err1}"

    # Case 2: strided Bottleneck with 1x1-Conv+BN downsample (ResNet layer entry)
    C_in2 = 64
    p2 = make_bottleneck_params(k3, C_in2, C_out, expansion, with_downsample=True)
    x2 = jax.random.normal(k4, (B, L, C_in2), jnp.float32)
    fwd2 = jax.jit(functools.partial(bottleneck_forward, stride=2))
    out2 = jax.block_until_ready(fwd2(x2, p2))
    ref2 = bottleneck_ref(x2, p2, stride=2)
    assert out2.shape == (B, L // 2, C_exp), out2.shape
    assert bool(jnp.all(jnp.isfinite(out2)))
    err2 = float(jnp.max(jnp.abs(out2 - ref2)))
    assert err2 < 5e-3, f"case2 max err {err2}"

    print("KERNEL_OK")
</pallas_src>

<mosaic_0001>
module attributes {stable_mosaic.version = 11 : i64} {
  func.func @_bottleneck_kernel(%arg0: i32, %arg1: i32, %arg2: memref<1x16x128xf32, #tpu.memory_space<vmem>>, %arg3: memref<128x32xbf16, #tpu.memory_space<vmem>>, %arg4: memref<1x32xf32, #tpu.memory_space<vmem>>, %arg5: memref<96x32xbf16, #tpu.memory_space<vmem>>, %arg6: memref<1x32xf32, #tpu.memory_space<vmem>>, %arg7: memref<32x128xbf16, #tpu.memory_space<vmem>>, %arg8: memref<1x128xf32, #tpu.memory_space<vmem>>, %arg9: memref<1x8x128xf32, #tpu.memory_space<vmem>>) attributes {dimension_semantics = [#tpu.dimension_semantics<parallel>, #tpu.dimension_semantics<parallel>], iteration_bounds = array<i64: 2, 2>, scalar_prefetch = 0 : i64, scratch_operands = 0 : i64, tpu.core_type = #tpu.core_type<tc>, window_params = [{transform_indices = @transform_0, window_bounds = array<i64: 1, 16, 128>}, {pipeline_mode = #tpu.pipeline_mode<synchronous>, transform_indices = @transform_1, window_bounds = array<i64: 128, 32>}, {pipeline_mode = #tpu.pipeline_mode<synchronous>, transform_indices = @transform_2, window_bounds = array<i64: 1, 32>}, {pipeline_mode = #tpu.pipeline_mode<synchronous>, transform_indices = @transform_3, window_bounds = array<i64: 96, 32>}, {pipeline_mode = #tpu.pipeline_mode<synchronous>, transform_indices = @transform_4, window_bounds = array<i64: 1, 32>}, {pipeline_mode = #tpu.pipeline_mode<synchronous>, transform_indices = @transform_5, window_bounds = array<i64: 32, 128>}, {pipeline_mode = #tpu.pipeline_mode<synchronous>, transform_indices = @transform_6, window_bounds = array<i64: 1, 128>}, {transform_indices = @transform_7, window_bounds = array<i64: 1, 8, 128>}]} {
    %c8_i32 = arith.constant 8 : i32
    %0 = arith.muli %arg1, %c8_i32 : i32
    %c0 = arith.constant 0 : index
    %1 = arith.index_cast %0 : i32 to index
    %c0_0 = arith.constant 0 : index
    %2 = vector.load %arg2[%c0, %1, %c0_0] : memref<1x16x128xf32, #tpu.memory_space<vmem>>, vector<1x8x128xf32>
    %3 = vector.shape_cast %2 : vector<1x8x128xf32> to vector<8x128xf32>
    %c1_i32 = arith.constant 1 : i32
    %4 = arith.subi %0, %c1_i32 : i32
    %c0_i32 = arith.constant 0 : i32
    %5 = arith.maxsi %4, %c0_i32 : i32
    %c8_i32_1 = arith.constant 8 : i32
    %6 = arith.addi %0, %c8_i32_1 : i32
    %c15_i32 = arith.constant 15 : i32
    %7 = arith.minsi %6, %c15_i32 : i32
    %c0_2 = arith.constant 0 : index
    %8 = arith.index_cast %5 : i32 to index
    %c0_3 = arith.constant 0 : index
    %9 = vector.load %arg2[%c0_2, %8, %c0_3] : memref<1x16x128xf32, #tpu.memory_space<vmem>>, vector<1x1x128xf32>
    %10 = vector.shape_cast %9 : vector<1x1x128xf32> to vector<1x128xf32>
    %c0_4 = arith.constant 0 : index
    %11 = arith.index_cast %7 : i32 to index
    %c0_5 = arith.constant 0 : index
    %12 = vector.load %arg2[%c0_4, %11, %c0_5] : memref<1x16x128xf32, #tpu.memory_space<vmem>>, vector<1x1x128xf32>
    %13 = vector.shape_cast %12 : vector<1x1x128xf32> to vector<1x128xf32>
    %14 = tpu.concatenate %10, %3, %13 in 0 : vector<1x128xf32>, vector<8x128xf32>, vector<1x128xf32> -> vector<10x128xf32>
    %15 = arith.truncf %14 : vector<10x128xf32> to vector<10x128xbf16>
    %c0_6 = arith.constant 0 : index
    %c0_7 = arith.constant 0 : index
    %16 = vector.load %arg3[%c0_6, %c0_7] : memref<128x32xbf16, #tpu.memory_space<vmem>>, vector<128x32xbf16>
    %cst = arith.constant dense<0.000000e+00> : vector<10x32xf32>
    %17 = tpu.matmul %15, %16, %cst {dimension_numbers = #tpu.dot_dimension_numbers<[1], [0], [0], [1], [0, 0, 1, 1], [], []>} : vector<10x128xbf16>, vector<128x32xbf16>, vector<10x32xf32> -> vector<10x32xf32>
    %c0_8 = arith.constant 0 : index
    %c0_9 = arith.constant 0 : index
    %18 = vector.load %arg4[%c0_8, %c0_9] : memref<1x32xf32, #tpu.memory_space<vmem>>, vector<1x32xf32>
    %19 = vector.broadcast %18 : vector<1x32xf32> to vector<10x32xf32>
    %20 = arith.addf %17, %19 : vector<10x32xf32>
    %21 = math.tanh %20 : vector<10x32xf32>
    %22 = tpu.iota {dimensions = array<i32: 0>} : vector<10x1xi32>
    %c0_i32_10 = arith.constant 0 : i32
    %23 = vector.broadcast %c0_i32_10 : i32 to vector<10x1xi32>
    %24 = arith.cmpi sgt, %22, %23 : vector<10x1xi32>
    %c0_i32_11 = arith.constant 0 : i32
    %25 = arith.cmpi sgt, %arg1, %c0_i32_11 : i32
    %26 = vector.broadcast %25 : i1 to vector<10x1xi1>
    %27 = arith.ori %24, %26 : vector<10x1xi1>
    %c9_i32 = arith.constant 9 : i32
    %28 = vector.broadcast %c9_i32 : i32 to vector<10x1xi32>
    %29 = arith.cmpi slt, %22, %28 : vector<10x1xi32>
    %c1_i32_12 = arith.constant 1 : i32
    %30 = arith.cmpi slt, %arg1, %c1_i32_12 : i32
    %31 = vector.broadcast %30 : i1 to vector<10x1xi1>
    %32 = arith.ori %29, %31 : vector<10x1xi1>
    %33 = arith.andi %27, %32 : vector<10x1xi1>
    %cst_13 = arith.constant 0.000000e+00 : f32
    %34 = vector.shape_cast %33 : vector<10x1xi1> to vector<10x1xi1>
    %35 = vector.broadcast %34 : vector<10x1xi1> to vector<10x32xi1>
    %36 = vector.broadcast %cst_13 : f32 to vector<10x32xf32>
    %37 = arith.select %35, %21, %36 : vector<10x32xi1>, vector<10x32xf32>
    %38 = vector.extract_strided_slice %37 {offsets = [0, 0], sizes = [8, 32], strides = [1, 1]} : vector<10x32xf32> to vector<8x32xf32>
    %39 = vector.extract_strided_slice %37 {offsets = [1, 0], sizes = [8, 32], strides = [1, 1]} : vector<10x32xf32> to vector<8x32xf32>
    %40 = vector.extract_strided_slice %37 {offsets = [2, 0], sizes = [8, 32], strides = [1, 1]} : vector<10x32xf32> to vector<8x32xf32>
    %41 = tpu.concatenate %38, %39, %40 in 1 : vector<8x32xf32>, vector<8x32xf32>, vector<8x32xf32> -> vector<8x96xf32>
    %42 = arith.truncf %41 : vector<8x96xf32> to vector<8x96xbf16>
    %c0_14 = arith.constant 0 : index
    %c0_15 = arith.constant 0 : index
    %43 = vector.load %arg5[%c0_14, %c0_15] : memref<96x32xbf16, #tpu.memory_space<vmem>>, vector<96x32xbf16>
    %cst_16 = arith.constant dense<0.000000e+00> : vector<8x32xf32>
    %44 = tpu.matmul %42, %43, %cst_16 {dimension_numbers = #tpu.dot_dimension_numbers<[1], [0], [0], [1], [0, 0, 1, 1], [], []>} : vector<8x96xbf16>, vector<96x32xbf16>, vector<8x32xf32> -> vector<8x32xf32>
    %c0_17 = arith.constant 0 : index
    %c0_18 = arith.constant 0 : index
    %45 = vector.load %arg6[%c0_17, %c0_18] : memref<1x32xf32, #tpu.memory_space<vmem>>, vector<1x32xf32>
    %46 = vector.broadcast %45 : vector<1x32xf32> to vector<8x32xf32>
    %47 = arith.addf %44, %46 : vector<8x32xf32>
    %48 = math.tanh %47 : vector<8x32xf32>
    %49 = arith.truncf %48 : vector<8x32xf32> to vector<8x32xbf16>
    %c0_19 = arith.constant 0 : index
    %c0_20 = arith.constant 0 : index
    %50 = vector.load %arg7[%c0_19, %c0_20] : memref<32x128xbf16, #tpu.memory_space<vmem>>, vector<32x128xbf16>
    %cst_21 = arith.constant dense<0.000000e+00> : vector<8x128xf32>
    %51 = tpu.matmul %49, %50, %cst_21 {dimension_numbers = #tpu.dot_dimension_numbers<[1], [0], [0], [1], [0, 0, 1, 1], [], []>} : vector<8x32xbf16>, vector<32x128xbf16>, vector<8x128xf32> -> vector<8x128xf32>
    %c0_22 = arith.constant 0 : index
    %c0_23 = arith.constant 0 : index
    %52 = vector.load %arg8[%c0_22, %c0_23] : memref<1x128xf32, #tpu.memory_space<vmem>>, vector<1x128xf32>
    %53 = vector.broadcast %52 : vector<1x128xf32> to vector<8x128xf32>
    %54 = arith.addf %51, %53 : vector<8x128xf32>
    %55 = arith.addf %54, %3 : vector<8x128xf32>
    %56 = math.tanh %55 : vector<8x128xf32>
    %c0_24 = arith.constant 0 : index
    %c0_25 = arith.constant 0 : index
    %c0_26 = arith.constant 0 : index
    %57 = vector.load %arg9[%c0_24, %c0_25, %c0_26] : memref<1x8x128xf32, #tpu.memory_space<vmem>>, vector<1x8x128xf32>
    %58 = vector.shape_cast %57 : vector<1x8x128xf32> to vector<8x128xf32>
    %59 = vector.shape_cast %56 : vector<8x128xf32> to vector<1x8x128xf32>
    tpu.vector_store %arg9[%c0_24, %c0_25, %c0_26], %59 {strides = array<i32>} : memref<1x8x128xf32, #tpu.memory_space<vmem>>, vector<1x8x128xf32>,
    return
  }
  func.func @transform_0(%arg0: i32, %arg1: i32) -> (i32, i32, i32) {
    %c0_i32 = arith.constant 0 : i32
    %c0_i32_0 = arith.constant 0 : i32
    %c0_i32_1 = arith.constant 0 : i32
    return %arg0, %c0_i32, %c0_i32_0 : i32, i32, i32
  }
  func.func @transform_1(%arg0: i32, %arg1: i32) -> (i32, i32) {
    %c0_i32 = arith.constant 0 : i32
    %c0_i32_0 = arith.constant 0 : i32
    %c0_i32_1 = arith.constant 0 : i32
    return %c0_i32, %c0_i32_0 : i32, i32
  }
  func.func @transform_2(%arg0: i32, %arg1: i32) -> (i32, i32) {
    %c0_i32 = arith.constant 0 : i32
    %c0_i32_0 = arith.constant 0 : i32
    %c0_i32_1 = arith.constant 0 : i32
    return %c0_i32, %c0_i32_0 : i32, i32
  }
  func.func @transform_3(%arg0: i32, %arg1: i32) -> (i32, i32) {
    %c0_i32 = arith.constant 0 : i32
    %c0_i32_0 = arith.constant 0 : i32
    %c0_i32_1 = arith.constant 0 : i32
    return %c0_i32, %c0_i32_0 : i32, i32
  }
  func.func @transform_4(%arg0: i32, %arg1: i32) -> (i32, i32) {
    %c0_i32 = arith.constant 0 : i32
    %c0_i32_0 = arith.constant 0 : i32
    %c0_i32_1 = arith.constant 0 : i32
    return %c0_i32, %c0_i32_0 : i32, i32
  }
  func.func @transform_5(%arg0: i32, %arg1: i32) -> (i32, i32) {
    %c0_i32 = arith.constant 0 : i32
    %c0_i32_0 = arith.constant 0 : i32
    %c0_i32_1 = arith.constant 0 : i32
    return %c0_i32, %c0_i32_0 : i32, i32
  }
  func.func @transform_6(%arg0: i32, %arg1: i32) -> (i32, i32) {
    %c0_i32 = arith.constant 0 : i32
    %c0_i32_0 = arith.constant 0 : i32
    %c0_i32_1 = arith.constant 0 : i32
    return %c0_i32, %c0_i32_0 : i32, i32
  }
  func.func @transform_7(%arg0: i32, %arg1: i32) -> (i32, i32, i32) {
    %c0_i32 = arith.constant 0 : i32
    %c0_i32_0 = arith.constant 0 : i32
    return %arg0, %arg1, %c0_i32 : i32, i32, i32
  }
}

</mosaic_0001>

<bundles_post_ra>
// kernel: bottleneck_forward.1
= control target key start
LH: loop header
LB: loop body
LE: loop exit
PB: predicated region body
PF: predicated region fallthrough
CT: control target
= control target key end

     0   :  { %12 = vsyncpa [#allocation3], 0  ;;  %s1293_s0 = inlined_call_operand.vmem [shape: f32[2,16,128], index: 0, kind: input, shape index: {}]   ;;  %s1294_s1 = inlined_call_operand.vmem [shape: bf16[128,32], index: 1, kind: input, shape index: {}]   ;;  %s1295_s2 = inlined_call_operand.vmem [shape: f32[1,32], index: 2, kind: input, shape index: {}]   ;;  %s1296_s3 = inlined_call_operand.vmem [shape: bf16[96,32], index: 3, kind: input, shape index: {}]   ;;  %s1297_s4 = inlined_call_operand.vmem [shape: f32[1,32], index: 4, kind: input, shape index: {}]   ;;  %s1298_s5 = inlined_call_operand.vmem [shape: bf16[32,128], index: 5, kind: input, shape index: {}]   ;;  %s1299_s6 = inlined_call_operand.vmem [shape: f32[1,128], index: 6, kind: input, shape index: {}]   ;;  %s1300_s7 = inlined_call_operand.hbm [shape: f32[2,16,128], index: 7, kind: output, shape index: {}]  }
   0x1   :  { %14 = vsyncpa [#allocation3 + $0x1], 0  ;;  %s1077_s24 = smov 0   ;;  %s1079_s25 = smov 0  }
   0x2   :  { %s1081_s26 = smov 0   ;;  %s1083_s27 = smov 0  }
   0x3   :  { %s1085_s28 = smov 0   ;;  %s1087_s29 = smov 0  }
   0x4   :  { %s1089_s30 = smov 0   ;;  %s1091_s8 = smov 0  }
   0x5 LB: > { %1304 = sst [smem:[#allocation5_spill]] %s1026_s30  ;;  %s739_s9 = sadd.s32 4294967295, %s1030_s8   ;;  %s1030_s8 = sphi %s1091_s8, %s20_s8   ;;  %s1026_s30 = sphi %s1089_s30, %s1311_s30   ;;  %s1022_s29 = sphi %s1087_s29, %s1316_s29   ;;  %s1018_s28 = sphi %s1085_s28, %s1309_s28   ;;  %s1014_s27 = sphi %s1083_s27, %s1315_s27   ;;  %s1010_s26 = sphi %s1081_s26, %s1314_s26   ;;  %s1006_s25 = sphi %s1079_s25, %s1313_s25   ;;  %s1002_s24 = sphi %s1077_s24, %s1312_s24  }
   0x6   : > { %s740_s10 = sadd.s32 4294967294, %s1030_s8   ;;  %s29_s11 = sadd.s32 1, %s1022_s29 }
   0x7   : > { %p30_p0 = scmp.ge.s32.totalorder %s29_s11, 2  ;;  %s32_s12 = sadd.s32 1, %s1026_s30 }
   0x8   : > { %p203_p1 = scmp.ne.s32.totalorder %s1010_s26, %s1006_s25  ;;  %p204_p2 = scmp.eq.s32.totalorder %s739_s9, 3 }
   0x9   : > { %s1318_s11 = smov (%p30_p0, %s29_s11), 0  ;;  %s1320_s12 = smov (!%p30_p0, %s32_s12), %s1026_s30 }
   0xa   : > { %1305 = sst [smem:[#allocation6_spill]] %s1318_s11  ;;  %s189_s13 = ssub.s32 %s1022_s29, %s1318_s11 }
   0xb   : > { %p1128_p3 = por %p204_p2, %p203_p1  ;;  %p34_p4 = scmp.ge.s32.totalorder %s1320_s12, 2 }
   0xc   : > { %p209_p5 = scmp.ne.s32.totalorder %s1006_s25, %s1002_s24  ;;  %p210_p6 = scmp.eq.s32.totalorder %s740_s10, 3 }
   0xd   : > { %p743_p7 = scmp.ge.s32.totalorder %s1030_s8, 1  ;;  %s1322_s12 = smov (%p34_p4, %s1320_s12), 0 }
   0xe   : > { %1307 = sst [smem:[#allocation7_spill]] %s1322_s12  ;;  %p1137_p8 = por %p210_p6, %p209_p5 }
   0xf   : > { %p254_p9 = scmp.lt.s32.totalorder %s1030_s8, 5  ;;  %s188_s16 = ssub.s32 %s1026_s30, %s1322_s12 }
  0x10   : > { %s193_s17 = sadd.s32 1, %s1010_s26  ;;  %s190_s18 = sor.u32 %s189_s13, %s188_s16 }
  0x11   : > { %p255_p10 = pnand %p743_p7, %p254_p9  ;;  %p191_p11 = scmp.eq.s32.totalorder %s190_s18, 0 }
  0x12   : > { %p286_p12 = scmp.lt.s32.totalorder (!%p255_p10), %s1018_s28, 1  ;;  %s747_s9 = sshll.u32 (!%p255_p10), %s1014_s27, 3 }
  0x13   : > { %s1146_s19 = scalar_select %p191_p11, %s1010_s26, %s193_s17  }
  0x14   : > { %258 = sbr.rel (%p255_p10) target bundleno = 832 (0x340), region = 48  ;;  %s748_s17 = sadd.s32 (!%p255_p10), 4294967295, %s747_s9 }
  0x15   : > { %s298_s18 = sadd.s32 (!%p255_p10), 8, %s747_s9  ;;  %p296_p13 = scmp.gt.s32.totalorder (!%p255_p10), %s748_s17, 0 }
  0x16   : > { %p299_p0 = scmp.lt.s32.totalorder (!%p255_p10), %s298_s18, 15  ;;  %p434_p1 = scmp.gt.s32.totalorder (!%p255_p10), %s1014_s27, 0 }
  0x17   : > { %p442_p2 = scmp.lt.s32.totalorder (!%p255_p10), %s1014_s27, 1  ;;  %s1034_s13 = smov (!%p255_p10), 32  }
  0x18   : > { %s1035_s16 = smov (!%p255_p10), 64  }
  0x19   : > { %v914_v0 = vld [vmem:[%s1294_s1 + $0x38] sm:$0xff]   ;;  %v1032_v1 = vmov 0.0   ;;  %v915_v2 = vld [vmem:[%s1294_s1 + $0x30] sm:$0xff]   ;;  %vm1033_vm0 = vmmov 0   ;;  %s287_s10 = scalar_select %p286_p12, %s1018_s28, 1  ;;  %v916_v3 = vld [vmem:[%s1294_s1 + $0x28] sm:$0xff]   ;;  %v429_v27 = vlaneseq }
  0x1a   : > { %795 = vmatprep.subr.bf16.mxu0 %v1032_v1  ;;  %815 = vmatprep.subr.bf16.mxu1 %v1032_v1  ;;  %v917_v4 = vld [vmem:[%s1294_s1 + $0x20] sm:$0xff]   ;;  %v918_v5 = vld [vmem:[%s1294_s1 + $0x18] sm:$0xff]   ;;  %s1324_s18 = smov (!%p299_p0, %s298_s18), 15  ;;  %s1326_s17 = smov (!%p296_p13, %s748_s17), 0  ;;  %v919_v6 = vld [vmem:[%s1294_s1 + $0x10] sm:$0xff]   ;;  %vm311_vm1 = vcmask 1040384  }
  0x1b   : > { %796 = vmatpush3.bf16.msra.mxu0 %v914_v0  ;;  %811 = vmatprep.mubr.msk.bf16.mxu0 %vm1033_vm0, %v1032_v1  ;;  %s775_s22 = sshll.u32 %s287_s10, 4  ;;  %v920_v9 = vld [vmem:[%s1294_s1 + $0x8] sm:$0xff]   ;;  %v921_v13 = vld [vmem:[%s1294_s1] sm:$0xff]   ;;  %v924_v19 = vld [vmem:[%s1296_s3 + $0x18] sm:$0xff]   ;;  %v430_v29 = vshrl.u32 %v429_v27, 7  ;;  %vm458_vm8 = vcmask 1046528  }
  0x1c   : > { %797 = vmatprep.subr.bf16.mxu0 %v1032_v1  ;;  %827 = vmatprep.mubr.msk.bf16.mxu1 %vm1033_vm0, %v1032_v1  ;;  %s290_s11 = scalar_lea.vmem %s1293_s0, %s775_s22  ;;  %v922_v17 = vld [vmem:[%s1296_s3 + $0x28] sm:$0xff]   ;;  %v923_v18 = vld [vmem:[%s1296_s3 + $0x20] sm:$0xff]   ;;  %v925_v20 = vld [vmem:[%s1296_s3 + $0x10] sm:$0xff]   ;;  %vm465_vm9 = vcmask 1045504   ;;  %vm472_vm10 = vcmask 261120   ;;  %vm474_vm11 = vcmask 523264  }
  0x1d   : > { %s293_s20 = scalar_lea.vmem %s290_s11, %s747_s9  ;;  %s303_s10 = scalar_lea.vmem %s290_s11, %s1324_s18  ;;  %816 = vmatpush3.bf16.msra.mxu1 %v922_v17  ;;  %v749_v21 = vld [vmem:[%s1295_s2] ss:$0 sm:$0xff]  ;;  %v926_v31 = vld [vmem:[%s1296_s3 + $0x8] sm:$0xff]   ;;  %v431_v32 = vadd.s32 8, %v430_v29  ;;  %vm432_vm2 = vcmp.gt.s32.totalorder %v430_v29, 0  ;;  %vm532_vm12 = vcmask 785408  }
  0x1e   : > { %v1183_v7 = vld [vmem:[%s293_s20] sm:$0xff]  ;;  %s301_s12 = scalar_lea.vmem %s290_s11, %s1326_s17  ;;  %817 = vmatprep.subr.bf16.mxu1 %v1032_v1  ;;  %v928_v50 = vld [vmem:[%s1298_s5 + $0x8] sm:$0xff]   ;;  %s283_s11 = sand.u32 1, %s1006_s25  }
  0x1f   : > { %798 = vmatpush3.bf16.msra.mxu0 %v915_v2  ;;  %v304_v8 = vld [vmem:[%s303_s10] sm:$0x1]  ;;  %v306_v10 = vrot.slane %v1183_v7, 7  ;;  %s435_s22 = scalar_select %p434_p1, 1, 0  ;;  %vm441_vm4 = vcmp.lt.s32.totalorder %v431_v32, 9 }
  0x20   : > { %799 = vmatprep.subr.bf16.mxu0 %v1032_v1  ;;  %v309_v11 = vrot.slane %v304_v8, 7  ;;  %v302_v12 = vld [vmem:[%s301_s12] sm:$0x1]  ;;  %s443_s30 = scalar_select %p442_p2, 1, 0 }
  0x21   : > { %v312_v14 = vsel %vm311_vm1, %v302_v12, %v306_v10  ;;  %818 = vmatpush3.bf16.msra.mxu1 %v923_v18  ;;  %v436_v30 = vstv %s435_s22  ;;  %v927_v34 = vld [vmem:[%s1296_s3] sm:$0xff]   ;;  %s744_s17 = sshll.u32 %s283_s11, 3  ;;  %s771_s18 = sshll.u32 %s1018_s28, 1 }
  0x22   : > { %v313_v15 = vsel %vm311_vm1, %v306_v10, %v309_v11  ;;  %819 = vmatprep.subr.bf16.mxu1 %v1032_v1  ;;  %v444_v33 = vstv %s443_s30  ;;  %vm437_vm3 = vcmp.eq.s32.totalorder %v436_v30, 1  ;;  %v929_v51 = vld [vmem:[%s1298_s5] sm:$0xff]   ;;  %s285_s20 = scalar_lea.vmem [#allocation2], %s744_s17  ;;  %s648_s22 = scalar_lea.sflag [#allocation3], %s283_s11 }
  0x23   : > { %800 = vmatpush3.bf16.msra.mxu0 %v916_v3  ;;  %v314_v16 = vpack.c.bf16 %v313_v15, %v312_v14  ;;  %vm445_vm5 = vcmp.eq.s32.totalorder %v444_v33, 1  ;;  %vm438_vm6 = vmor %vm432_vm2, %vm437_vm3  ;;  %v758_v52 = vld [vmem:[%s1297_s4] ss:$0 sm:$0xff]  ;;  %s663_s10 = sshll.u32 %s285_s20, 4  ;;  %s1036_s9 = smov [#allocation2]   ;;  %s664_s10 = int_to_ptr.vmem [resolvable:$true] %s663_s10 }
  0x24   : > { %801 = vmatprep.subr.bf16.mxu0 %v1032_v1  ;;  %vm447_vm7 = vmor %vm441_vm4, %vm445_vm5  ;;  %v766_v60 = vld [vmem:[%s1299_s6] ss:$0 sm:$0xff]  ;;  %s938_s30 = scalar_lea.vmem %s664_s10, 128  ;;  %s942_s28 = sshll.u32 %s1036_s9, 4  ;;  %s943_s28 = int_to_ptr.vmem [resolvable:$false] %s942_s28 }
  0x25   : > { %820 = vmatpush3.bf16.msra.mxu1 %v924_v19  ;;  %p939_p4 = scmp.ne.s32.totalorder %s664_s10, %s938_s30  ;;  %p945_p7 = scmp.lt.s32.totalorder %s664_s10, %s943_s28 }
  0x26   : > { %821 = vmatprep.subr.bf16.mxu1 %v1032_v1 }
  0x27   : > { %802 = vmatpush3.bf16.msra.mxu0 %v917_v4  ;;  %p940_p5 = pnand %p939_p4, %p1128_p3 }
  0x28   : > { %803 = vmatprep.subr.bf16.mxu0 %v1032_v1 }
  0x29   : > { %822 = vmatpush3.bf16.msra.mxu1 %v925_v20  ;;  %p941_p6 = pneg %p940_p5 }
  0x2a   : > { %823 = vmatprep.subr.bf16.mxu1 %v1032_v1 }
  0x2b   : > { %804 = vmatpush3.bf16.msra.mxu0 %v918_v5 }
  0x2c   : > { %805 = vmatprep.subr.bf16.mxu0 %v1032_v1 }
  0x2d   : > { %824 = vmatpush3.bf16.msra.mxu1 %v926_v31 }
  0x2e   : > { %825 = vmatprep.subr.bf16.mxu1 %v1032_v1 }
  0x2f   : > { %806 = vmatpush3.bf16.msra.mxu0 %v919_v6 }
  0x30   : > { %807 = vmatprep.subr.bf16.mxu0 %v1032_v1 }
  0x31   : > { %826 = vmatpush3.bf16.msra.mxu1 %v927_v34 }
  0x32   : > { %831 = vmatprep.subr.bf16.mxu1 %v1032_v1 }
  0x33   : > { %808 = vmatpush3.bf16.msra.mxu0 %v920_v9 }
  0x34   : > { %809 = vmatprep.subr.bf16.mxu0 %v1032_v1 }
  0x37   : > { %810 = vmatpush3.bf16.msra.mxu0 %v921_v13 }
  0x3a   : > { %812 = vmatmul.mubr.bf16.vlgmr.msra.gmra.mxu0 %v314_v16 }
  0xfa   : > { %v420_v22 = vpop.f32.mrf.mxu0 }
  0xfb   : > { %v421_v23 = vadd.f32 %v749_v21, %v420_v22 }
  0xfc   : > { %v813_v24 = vpop.f32.mrf.mxu0 }
  0xfd   : > { %930 = vtanh.f32 %v421_v23 }
  0xfe   : > { %v423_v25 = vpop.f32.mrf.mxu0 }
  0xff   : > { %v424_v26 = vadd.f32 %v749_v21, %v423_v25 }
 0x100   : > { %v814_v28 = vpop.f32.mrf.mxu0 }
 0x101   : > { %932 = vtanh.f32 %v424_v26 }
 0x10a   : > { %v931_v35 = vpop.eup %930 }
 0x10b   : > { %v454_v36 = vsel %vm438_vm6, %v931_v35, 0.0 }
 0x10c   : > { %v459_v39 = vrot.slane %v454_v36, 1  ;;  %v466_v43 = vrot.slane %v454_v36, 2 }
 0x10e   : > { %v933_v37 = vpop.eup %932 }
 0x10f   : > { %v455_v38 = vsel %vm447_vm7, %v933_v37, 0.0 }
 0x110   : > { %v460_v40 = vrot.slane %v455_v38, 1  ;;  %v467_v42 = vrot.slane %v455_v38, 2 }
 0x112   : > { %v461_v41 = vsel %vm458_vm8, %v459_v39, %v460_v40  ;;  %v468_v44 = vsel %vm465_vm9, %v466_v43, %v467_v42 }
 0x113   : > { %462 = vrot.lane.b32.xlu0 %v461_v41, %s1034_s13  ;;  %s659_s13 = sadd.s32 %s1014_s27, %s771_s18  ;;  %s944_s27 = scalar_lea.vmem %s943_s28, 256 }
 0x114   : > { %p946_p9 = scmp.lt.s32.totalorder %s944_s27, %s938_s30 }
 0x116   : > { %p947_p10 = por %p946_p9, %p945_p7 }
 0x117   : > { %469 = vrot.lane.b32.xlu0 %v468_v44, %s1035_s16  ;;  %s772_s16 = sshll.u32 %s659_s13, 7 }
 0x118   : > { %s1247_s23 = scalar_lea.hbm %s1300_s7, %s772_s16  ;;  %p948_p11 = pnand %p947_p10, %p941_p6 }
 0x185   : > { %v463_v45 = vpop.permute.xlu0 %462 }
 0x186   : > { %v473_v46 = vsel %vm472_vm10, %v454_v36, %v463_v45 }
 0x189   : > { %v470_v47 = vpop.permute.xlu0 %469 }
 0x18a   : > { %v475_v48 = vsel %vm474_vm11, %v473_v46, %v470_v47 }
 0x18b   : > { %v476_v49 = vpack.c.bf16 %v475_v48, %v475_v48 }
 0x18d   : > { %828 = vmatmul.mubr.msk.bf16.vlgmr.msra.gmra.mxu1 %vm532_vm12, %v476_v49 }
 0x18e   : > { %835 = vmatprep.mubr.msk.bf16.mxu1 %vm1033_vm0, %v1032_v1  ;;  %832 = vmatpush3.bf16.msra.mxu1 %v928_v50 }
 0x18f   : > { %833 = vmatprep.subr.bf16.mxu1 %v1032_v1 }
 0x192   : > { %834 = vmatpush3.bf16.msra.mxu1 %v929_v51 }
 0x24d   : > { %v570_v53 = vpop.f32.mrf.mxu1 }
 0x24e   : > { %v571_v54 = vadd.f32 %v758_v52, %v570_v53 }
 0x24f   : > { %v829_v55 = vpop.f32.mrf.mxu1 }
 0x250   : > { %934 = vtanh.f32 %v571_v54 }
 0x251   : > { %v573_v56 = vpop.f32.mrf.mxu1 }
 0x253   : > { %v830_v57 = vpop.f32.mrf.mxu1 }
 0x25d   : > { %v935_v58 = vpop.eup %934 }
 0x25e   : > { %v577_v59 = vpack.c.bf16 %v935_v58, %v935_v58 }
 0x260   : > { %836 = vmatmul.mubr.msk.bf16.vlgmr.msra.gmra.mxu1 %vm472_vm10, %v577_v59 }
 0x320   : > { %v638_v61 = vpop.f32.mrf.mxu1 }
 0x321   : > { %v639_v62 = vadd.f32 %v766_v60, %v638_v61 }
 0x322   : > { %v837_v63 = vpop.f32.mrf.mxu1 }
 0x323   : > { %v644_v0 = vadd.f32 %v639_v62, %v1183_v7 }
 0x324   : > { %v641_v1 = vpop.f32.mrf.mxu1 }
 0x325   : > { %936 = vtanh.f32 %v644_v0 }
 0x326   : > { %v838_v2 = vpop.f32.mrf.mxu1 }
 0x332   : > { %v937_v3 = vpop.eup %936 }
 0x333   : > { %646 = vst [vmem:[%s285_s20] sm:$0xff] %v937_v3 }
 0x334   : > { %951 = shalt.err (!%p948_p11)
}
 0x335   : > { %s952_s17 = scalar_lea.hbm %s1247_s23, 128  ;;  %s956_s13 = scalar_lea.hbm %s1300_s7, 512 }
 0x336   : > { %p953_p12 = scmp.ne.s32.totalorder %s1247_s23, %s952_s17  ;;  %p957_p1 = scmp.lt.s32.totalorder %s1247_s23, %s1300_s7 }
 0x337   : > { %p958_p2 = scmp.lt.s32.totalorder %s956_s13, %s952_s17 }
 0x338   : > { %p954_p13 = pnand %p953_p12, %p1128_p3 }
 0x339   : > { %p959_p4 = por %p958_p2, %p957_p1 }
 0x33a   : > { %p955_p0 = pneg %p954_p13 }
 0x33c   : > { %p960_p5 = pnand %p959_p4, %p955_p0 }
 0x33e   : > { %963 = shalt.err (!%p960_p5)
}
 0x33f   : > { %839 = dma.vmem_to_hbm [thread:$0]  (%p1128_p3), %s664_s10, 128, %s1247_s23, %s648_s22  }
 0x340 PF: > { %p845_p6 = scmp.ge.s32.totalorder %s1030_s8, 2  ;;  %s675_s21 = sand.u32 1, %s1002_s24  }
 0x341   : > { %s676_s12 = scalar_lea.sflag [#allocation3], %s675_s21 }
 0x342   : > { %p842_p7 = pnand %p845_p6, %p1137_p8 }
 0x344   : > { %p843_p9 = pneg %p842_p7 }
 0x346   : > { %997 = dma.done.wait (%p843_p9), %s676_s12, 128  }
 0x347   : > { %999 = vsyncadd (%p843_p9), %s676_s12, 4294967168  ;;  %s20_s8 = sadd.s32 1, %s1030_s8   ;;  %s1309_s28 = sld [smem:[#allocation5_spill]] }
 0x348   : > { %p17_p10 = scmp.ge.s32.totalorder %s20_s8, 6   ;;  %s1310_s14 = sld [smem:[#allocation6_spill]] }
 0x349   : > { %s1311_s30 = sld [smem:[#allocation7_spill]]  ;;  %s1312_s24 = smov %s1006_s25 }
 0x34a   : > { %s1313_s25 = smov %s1010_s26  ;;  %s1314_s26 = smov %s1146_s19 }
 0x34b   : > { %s1315_s27 = smov %s1022_s29  ;;  %19 = sbr.rel (!%p17_p10) target bundleno = 5 (0x5), region = 86 }
 0x34e   : > { %s1316_s29 = smov %s1310_s14 }
 0x350   :  { %681 = vsyncpa [#allocation3], 1 }
 0x351   :  { %683 = vsyncpa [#allocation3 + $0x1], 1 }

</bundles_post_ra>
